<compile_context>
chip_gen: v6e
topology: v6e:2x2x1
jax: 0.10.0
libtpu: 0.0.40
codegen_flags: <defaults>
</compile_context>

<pallas_src>
import functools

import jax
import jax.numpy as jnp
from jax.experimental import pallas as pl
from jax.experimental.pallas import tpu as pltpu


_LANES = 128
_MAX_TILE_ROWS = 1024   # (1024, 128) f32 = 512 KiB per operand per block


def _smooth_l1_kernel(pred_ref, target_ref, out_ref, *, loss_weight):
    diff = jnp.abs(pred_ref[...] - target_ref[...])
    thresh = jnp.asarray(1.0 / 9.0, diff.dtype)
    # 0.5 * (3*diff)^2 == 4.5 * diff^2 ; linear branch: diff - 0.5/9
    loss = jnp.where(diff <= thresh,
                     4.5 * diff * diff,
                     diff - jnp.asarray(0.5 / 9.0, diff.dtype))
    if loss_weight != 1.0:
        loss = loss * jnp.asarray(loss_weight, diff.dtype)
    out_ref[...] = loss.astype(out_ref.dtype)


def smooth_l1_loss(pred, target, *, loss_weight=1.0):
    """Elementwise SmoothL1Loss (det3d variant). Returns array of pred.shape."""
    assert pred.shape == target.shape and pred.size > 0
    orig_shape = pred.shape
    dtype = pred.dtype
    n = pred.size

    pred_flat = pred.reshape(-1)
    target_flat = target.reshape(-1)

    # Only pad the ragged tail (< 128 elements). For the common NCHW feature
    # map case (numel % 128 == 0) this branch is skipped entirely and no
    # extra HBM copies are made.
    pad = (-n) % _LANES
    if pad:
        pred_flat = jnp.pad(pred_flat, (0, pad))
        target_flat = jnp.pad(target_flat, (0, pad))

    rows = (n + pad) // _LANES
    pred2d = pred_flat.reshape(rows, _LANES)
    target2d = target_flat.reshape(rows, _LANES)

    # Large block for bandwidth; if the whole array is smaller than one block,
    # use the full extent (block_shape == full dims is always legal).
    tile_rows = rows if rows <= _MAX_TILE_ROWS else _MAX_TILE_ROWS
    grid = (pl.cdiv(rows, tile_rows),)
    spec = pl.BlockSpec((tile_rows, _LANES), lambda i: (i, 0))

    kernel = functools.partial(_smooth_l1_kernel,
                               loss_weight=float(loss_weight))

    out2d = pl.pallas_call(
        kernel,
        out_shape=jax.ShapeDtypeStruct((rows, _LANES), dtype),
        grid=grid,
        in_specs=[spec, spec],
        out_specs=spec,
        compiler_params=pltpu.CompilerParams(
            dimension_semantics=("parallel",)),
    )(pred2d, target2d)

    out_flat = out2d.reshape(-1)
    if pad:
        out_flat = out_flat[:n]
    return out_flat.reshape(orig_shape)


class SmoothL1Loss:
    """JAX/Pallas port of det3d SmoothL1Loss (forward only).

    NOTE: mirroring the PyTorch reference forward exactly:
      * `beta` is accepted but unused (the reference hardcodes 3.0 in the math),
      * `reduction` is accepted but NO reduction is applied (the reference
        forward returns the elementwise loss map),
      * `loss_weight` IS applied.
    """

    def __init__(self, beta=1.0, reduction="mean", loss_weight=1.0):
        assert beta > 0
        self.beta = beta
        self.reduction = reduction
        self.loss_weight = loss_weight

    def __call__(self, pred, target):
        return smooth_l1_loss(pred, target, loss_weight=self.loss_weight)


def _reference(pred, target, loss_weight=1.0):
    diff = jnp.abs(pred - target)
    lt = (diff <= 1.0 / 3.0 ** 2).astype(diff.dtype)
    loss = lt * 0.5 * jnp.square(diff * 3.0) + (diff - 0.5 / 3.0 ** 2) * (1.0 - lt)
    return loss_weight * loss


if __name__ == "__main__":
    key = jax.random.PRNGKey(0)
    k1, k2 = jax.random.split(key)
    # Small NCHW-like regression tensors (e.g. bbox regression maps).
    pred = jax.random.normal(k1, (2, 4, 16, 16), dtype=jnp.float32)
    target = jax.random.normal(k2, (2, 4, 16, 16), dtype=jnp.float32)

    # loss_weight = 1.0 (reference default).
    loss_mod = SmoothL1Loss(beta=1.0, reduction="mean", loss_weight=1.0)
    out = jax.block_until_ready(loss_mod(pred, target))
    ref = _reference(pred, target, loss_weight=1.0)
    assert out.shape == pred.shape
    assert jnp.allclose(out, ref, atol=1e-6, rtol=1e-6)

    # Non-unit loss_weight is now honored by the kernel.
    loss_mod_w = SmoothL1Loss(beta=1.0, reduction="mean", loss_weight=2.5)
    out_w = jax.block_until_ready(loss_mod_w(pred, target))
    ref_w = _reference(pred, target, loss_weight=2.5)
    assert jnp.allclose(out_w, ref_w, atol=1e-6, rtol=1e-6)

    # Ragged-tail path (numel % 128 != 0) still correct.
    p3 = jax.random.normal(k1, (3, 5, 7), dtype=jnp.float32)
    t3 = jax.random.normal(k2, (3, 5, 7), dtype=jnp.float32)
    out3 = jax.block_until_ready(smooth_l1_loss(p3, t3))
    assert jnp.allclose(out3, _reference(p3, t3), atol=1e-6, rtol=1e-6)

    print("KERNEL_OK")
</pallas_src>

<mosaic_0001>
module attributes {stable_mosaic.version = 11 : i64} {
  func.func @_smooth_l1_kernel(%arg0: i32, %arg1: memref<16x128xf32, #tpu.memory_space<vmem>>, %arg2: memref<16x128xf32, #tpu.memory_space<vmem>>, %arg3: memref<16x128xf32, #tpu.memory_space<vmem>>) attributes {dimension_semantics = [#tpu.dimension_semantics<parallel>], iteration_bounds = array<i64: 1>, scalar_prefetch = 0 : i64, scratch_operands = 0 : i64, tpu.core_type = #tpu.core_type<tc>, window_params = [{transform_indices = @transform_0, window_bounds = array<i64: 16, 128>}, {transform_indices = @transform_1, window_bounds = array<i64: 16, 128>}, {transform_indices = @transform_2, window_bounds = array<i64: 16, 128>}]} {
    %c0 = arith.constant 0 : index
    %c0_0 = arith.constant 0 : index
    %0 = vector.load %arg1[%c0, %c0_0] : memref<16x128xf32, #tpu.memory_space<vmem>>, vector<16x128xf32>
    %c0_1 = arith.constant 0 : index
    %c0_2 = arith.constant 0 : index
    %1 = vector.load %arg2[%c0_1, %c0_2] : memref<16x128xf32, #tpu.memory_space<vmem>>, vector<16x128xf32>
    %2 = arith.subf %0, %1 : vector<16x128xf32>
    %3 = math.absf %2 : vector<16x128xf32>
    %cst = arith.constant 0.111111112 : f32
    %4 = vector.broadcast %cst : f32 to vector<16x128xf32>
    %5 = arith.cmpf ole, %3, %4 : vector<16x128xf32>
    %cst_3 = arith.constant 4.500000e+00 : f32
    %6 = vector.broadcast %cst_3 : f32 to vector<16x128xf32>
    %7 = arith.mulf %6, %3 : vector<16x128xf32>
    %8 = arith.mulf %7, %3 : vector<16x128xf32>
    %cst_4 = arith.constant 0.055555556 : f32
    %9 = vector.broadcast %cst_4 : f32 to vector<16x128xf32>
    %10 = arith.subf %3, %9 : vector<16x128xf32>
    %11 = arith.select %5, %8, %10 : vector<16x128xi1>, vector<16x128xf32>
    %c0_5 = arith.constant 0 : index
    %c0_6 = arith.constant 0 : index
    %12 = vector.load %arg3[%c0_5, %c0_6] : memref<16x128xf32, #tpu.memory_space<vmem>>, vector<16x128xf32>
    tpu.vector_store %arg3[%c0_5, %c0_6], %11 {strides = array<i32>} : memref<16x128xf32, #tpu.memory_space<vmem>>, vector<16x128xf32>,
    return
  }
  func.func @transform_0(%arg0: i32) -> (i32, i32) {
    %c0_i32 = arith.constant 0 : i32
    %c0_i32_0 = arith.constant 0 : i32
    return %arg0, %c0_i32 : i32, i32
  }
  func.func @transform_1(%arg0: i32) -> (i32, i32) {
    %c0_i32 = arith.constant 0 : i32
    %c0_i32_0 = arith.constant 0 : i32
    return %arg0, %c0_i32 : i32, i32
  }
  func.func @transform_2(%arg0: i32) -> (i32, i32) {
    %c0_i32 = arith.constant 0 : i32
    %c0_i32_0 = arith.constant 0 : i32
    return %arg0, %c0_i32 : i32, i32
  }
}

</mosaic_0001>

<bundles_post_ra>
// kernel: tpu_custom_call.1
= control target key start
LH: loop header
LB: loop body
LE: loop exit
PB: predicated region body
PF: predicated region fallthrough
CT: control target
= control target key end

     0   :  { %7 = vsyncpa [#allocation3], 0  ;;  %s189_s0 = inlined_call_operand.hbm [shape: f32[16,128], index: 0, kind: input, shape index: {}]   ;;  %s190_s1 = inlined_call_operand.hbm [shape: f32[16,128], index: 1, kind: input, shape index: {}]   ;;  %s191_s2 = inlined_call_operand.hbm [shape: f32[16,128], index: 2, kind: output, shape index: {}]  }
   0x1   :  { %8 = vsyncpa [#allocation6], 0 }
   0x2   :  { %9 = vsyncpa [#allocation4], 0  ;;  %s151_s9 = smov [#allocation2]  }
   0x3   :  { %s15_s10 = sshll.u32 %s151_s9, 4  ;;  %s16_s10 = int_to_ptr.vmem [resolvable:$true] %s15_s10 }
   0x4   :  { %s93_s11 = scalar_lea.vmem %s16_s10, 256  ;;  %p98_p1 = scmp.lt.s32.totalorder %s16_s10, %s16_s10 }
   0x5   :  { %p94_p0 = scmp.ne.s32.totalorder %s16_s10, %s93_s11  ;;  %p99_p2 = scmp.lt.s32.totalorder %s93_s11, %s93_s11 }
   0x7   :  { %p100_p3 = por %p99_p2, %p98_p1 }
   0x9   :  { %p101_p4 = pnand %p100_p3, %p94_p0 }
   0xb   :  { %104 = shalt.err (!%p101_p4)
}
   0xc   :  { %s152_s12 = smov 128   ;;  %s153_s13 = smov 8  }
   0xd   :  { %21 = dma.hbm_to_vmem [thread:$0]  %s189_s0, 256, %s16_s10, [#allocation3], %s152_s12, %s152_s12, %s153_s13  }
   0xe   :  { %s154_s16 = smov [#allocation5]  }
   0xf   :  { %s27_s17 = sshll.u32 %s154_s16, 4  ;;  %s28_s17 = int_to_ptr.vmem [resolvable:$true] %s27_s17 }
  0x10   :  { %s113_s18 = scalar_lea.vmem %s28_s17, 256  ;;  %p118_p6 = scmp.lt.s32.totalorder %s28_s17, %s28_s17 }
  0x11   :  { %p114_p5 = scmp.ne.s32.totalorder %s28_s17, %s113_s18  ;;  %p119_p7 = scmp.lt.s32.totalorder %s113_s18, %s113_s18 }
  0x13   :  { %p120_p8 = por %p119_p7, %p118_p6 }
  0x15   :  { %p121_p9 = pnand %p120_p8, %p114_p5 }
  0x17   :  { %124 = shalt.err (!%p121_p9)
}
  0x18   :  { %33 = dma.hbm_to_vmem [thread:$0]  %s190_s1, 256, %s28_s17, [#allocation6], %s152_s12, %s152_s12, %s153_s13  }
  0x19   :  { %145 = dma.done.wait [#allocation3], 256  }
  0x1a   :  { %146 = vsyncadd [#allocation3], 4294967040 }
  0x1b   :  { %147 = dma.done.wait [#allocation6], 256  }
  0x1c   :  { %148 = vsyncadd [#allocation6], 4294967040  ;;  %v40_v0 = vld [vmem:[#allocation2] sm:$0xff]  ;;  %v42_v1 = vld [vmem:[#allocation5] sm:$0xff]  ;;  %s155_s0 = smov [#allocation7]  }
  0x1d   :  { %v41_v2 = vld [vmem:[#allocation2 + $0x8] sm:$0xff]  ;;  %v44_v3 = vsub.f32 %v40_v0, %v42_v1  ;;  %v43_v4 = vld [vmem:[#allocation5 + $0x8] sm:$0xff]  ;;  %s65_s21 = sshll.u32 %s155_s0, 4  ;;  %s66_s21 = int_to_ptr.vmem [resolvable:$true] %s65_s21 }
  0x1e   :  { %v45_v5 = vsub.f32 %v41_v2, %v43_v4  ;;  %s125_s1 = scalar_lea.vmem %s66_s21, 256  ;;  %p130_p11 = scmp.lt.s32.totalorder %s66_s21, %s66_s21 }
  0x1f   :  { %v46_v6 = vand.u32 2147483647, %v44_v3  ;;  %p126_p10 = scmp.ne.s32.totalorder %s66_s21, %s125_s1  ;;  %p131_p12 = scmp.lt.s32.totalorder %s125_s1, %s125_s1 }
  0x20   :  { %v47_v7 = vand.u32 2147483647, %v45_v5 }
  0x21   :  { %v50_v8 = vmul.f32 4.5, %v46_v6  ;;  %v78_v9 = vadd.f32 -0.055555556, %v46_v6  ;;  %vm48_vm0 = vcmp.le.f32.partialorder %v46_v6, 0.11111111  ;;  %p132_p13 = por %p131_p12, %p130_p11 }
  0x22   :  { %v51_v10 = vmul.f32 4.5, %v47_v7  ;;  %v79_v11 = vadd.f32 -0.055555556, %v47_v7  ;;  %vm49_vm1 = vcmp.le.f32.partialorder %v47_v7, 0.11111111 }
  0x23   :  { %v52_v12 = vmul.f32 %v50_v8, %v46_v6  ;;  %p133_p0 = pnand %p132_p13, %p126_p10 }
  0x24   :  { %v53_v13 = vmul.f32 %v51_v10, %v47_v7 }
  0x25   :  { %v56_v14 = vsel %vm48_vm0, %v52_v12, %v78_v9 }
  0x26   :  { %58 = vst [vmem:[#allocation7] sm:$0xff] %v56_v14  ;;  %v57_v15 = vsel %vm49_vm1, %v53_v13, %v79_v11 }
  0x27   :  { %59 = vst [vmem:[#allocation7 + $0x8] sm:$0xff] %v57_v15 }
  0x28   :  { %136 = shalt.err (!%p133_p0)
}
  0x29   :  { %71 = dma.vmem_to_hbm [thread:$0]  %s66_s21, 256, %s191_s2, [#allocation4], %s152_s12, %s152_s12, %s153_s13  }
  0x2a   :  { %149 = dma.done.wait [#allocation4], 256  }
  0x2b   :  { %150 = vsyncadd [#allocation4], 4294967040 }
  0x2c   :  { %75 = vsyncpa [#allocation3], 1 }
  0x2d   :  { %76 = vsyncpa [#allocation6], 1 }
  0x2e   :  { %77 = vsyncpa [#allocation4], 1 }

</bundles_post_ra>
